<compile_context>
chip_gen: v7x
topology: tpu7x:2x2x1
jax: 0.10.0
libtpu: 0.0.40
codegen_flags: <defaults>
</compile_context>

<pallas_src>
import math
import functools

import jax
import jax.numpy as jnp
from jax import lax
from jax.experimental import pallas as pl
from jax.experimental.pallas import tpu as pltpu


# ----------------------------------------------------------------------------
# Kernels
# ----------------------------------------------------------------------------
def _pe_add_kernel(tokens_ref, pos_ref, out_ref):
    """Eval-mode forward: out = tokens + pos_embedding[rows] (dropout = identity)."""
    # tokens_ref: (TS, B, E), pos_ref: (TS, 1, E) -> broadcast over batch axis.
    out_ref[...] = (tokens_ref[...] + pos_ref[...]).astype(out_ref.dtype)


def _pe_add_dropout_kernel(seed_ref, tokens_ref, pos_ref, out_ref, *, p):
    """Training-mode forward: out = dropout(tokens + pos_embedding[rows], p).

    The keep/drop mask is a counter-based hash of (seed, global element index):
    deterministic per seed, independent of the tiling, and needs no TPU PRNG
    primitives (works under both Mosaic and interpret mode).
    """
    ts, b, e = tokens_ref.shape
    x = (tokens_ref[...] + pos_ref[...]).astype(jnp.float32)      # (TS, B, E)

    # Global element index for this tile.
    row0 = pl.program_id(0) * ts
    ri = lax.broadcasted_iota(jnp.int32, (ts, b, e), 0) + row0
    bi = lax.broadcasted_iota(jnp.int32, (ts, b, e), 1)
    ei = lax.broadcasted_iota(jnp.int32, (ts, b, e), 2)
    idx = (ri * (b * e) + bi * e + ei).astype(jnp.uint32)

    # Murmur3-style finalizer, seeded.
    seed = seed_ref[0].astype(jnp.uint32)
    h = idx ^ (seed * jnp.uint32(0x9E3779B9))
    h = h ^ (h >> jnp.uint32(16))
    h = h * jnp.uint32(0x85EBCA6B)
    h = h ^ (h >> jnp.uint32(13))
    h = h * jnp.uint32(0xC2B2AE35)
    h = h ^ (h >> jnp.uint32(16))

    # 31 random bits -> non-negative int32; drop with probability p.
    bits31 = (h >> jnp.uint32(1)).astype(jnp.int32)
    threshold = jnp.int32(int(p * float(2 ** 31)))
    keep = bits31 >= threshold
    scale = jnp.float32(1.0 / (1.0 - p))
    out_ref[...] = jnp.where(keep, x * scale, jnp.float32(0.0)).astype(out_ref.dtype)


# ----------------------------------------------------------------------------
# Parameter / buffer setup (plain JAX, identical to the PyTorch __init__)
# ----------------------------------------------------------------------------
def make_pos_embedding(emb_size: int, maxlen: int = 5000) -> jax.Array:
    den = jnp.exp(-jnp.arange(0, emb_size, 2, dtype=jnp.float32)
                  * math.log(10000.0) / emb_size)                 # (E/2,)
    pos = jnp.arange(0, maxlen, dtype=jnp.float32)[:, None]       # (maxlen, 1)
    pe = jnp.zeros((maxlen, emb_size), dtype=jnp.float32)
    pe = pe.at[:, 0::2].set(jnp.sin(pos * den))
    pe = pe.at[:, 1::2].set(jnp.cos(pos * den))
    return pe[:, None, :]                                         # (maxlen, 1, E)


# ----------------------------------------------------------------------------
# Wrapper
# ----------------------------------------------------------------------------
def positional_encoding_forward(tokens: jax.Array,
                                pos_embedding: jax.Array,
                                *,
                                dropout_p: float = 0.0,
                                training: bool = False,
                                seed: int = 0) -> jax.Array:
    """Pallas forward of PositionalEncoding.

    tokens:        (S, B, E)
    pos_embedding: (maxlen, 1, E) with maxlen >= S
    """
    S, B, E = tokens.shape
    maxlen = pos_embedding.shape[0]
    assert maxlen >= S, "pos_embedding too short for this sequence length"

    # Ship the pos stream in the token dtype (halves its HBM bytes for bf16).
    pos = pos_embedding
    if pos.dtype != tokens.dtype:
        pos = pos.astype(tokens.dtype)

    # Tile along S.  Target ~2 MiB token/out blocks: safe for v7x's 64 MiB VMEM
    # with double buffering, still big enough to amortize per-step overhead and
    # approach the HBM roofline on v5e/v6e.
    itemsize = jnp.dtype(tokens.dtype).itemsize
    bytes_per_row = max(1, B * E * itemsize)
    ts = max(1, (2 * 1024 * 1024) // bytes_per_row)
    if ts >= 8:
        ts -= ts % 8
    ts = min(ts, S)
    grid = (pl.cdiv(S, ts),)

    # Last two block dims equal the full array dims -> no (8,128) constraint.
    tok_spec = pl.BlockSpec((ts, B, E), lambda i: (i, 0, 0))
    pos_spec = pl.BlockSpec((ts, 1, E), lambda i: (i, 0, 0))   # full table, no slice
    out_spec = pl.BlockSpec((ts, B, E), lambda i: (i, 0, 0))
    out_shape = jax.ShapeDtypeStruct((S, B, E), tokens.dtype)

    block_bytes = ts * B * E * itemsize
    pos_bytes = ts * E * itemsize
    vmem_limit = int(min(96 * 1024 * 1024,
                         max(32 * 1024 * 1024,
                             2 * (2 * block_bytes + pos_bytes) + (8 << 20))))
    cparams = pltpu.CompilerParams(
        dimension_semantics=("parallel",),
        vmem_limit_bytes=vmem_limit,
    )

    if training and dropout_p > 0.0:
        if dropout_p >= 1.0:
            # torch.nn.Dropout(p=1.0) zeroes everything.
            return jnp.zeros((S, B, E), tokens.dtype)
        kernel = functools.partial(_pe_add_dropout_kernel, p=float(dropout_p))
        seed_arr = jnp.asarray([seed], dtype=jnp.int32)
        return pl.pallas_call(
            kernel,
            out_shape=out_shape,
            grid=grid,
            in_specs=[
                pl.BlockSpec(memory_space=pltpu.MemorySpace.SMEM),  # seed scalar
                tok_spec,
                pos_spec,
            ],
            out_specs=out_spec,
            compiler_params=cparams,
        )(seed_arr, tokens, pos)
    else:
        # Dropout in eval mode is the identity (exact PyTorch semantics).
        return pl.pallas_call(
            _pe_add_kernel,
            out_shape=out_shape,
            grid=grid,
            in_specs=[tok_spec, pos_spec],
            out_specs=out_spec,
            compiler_params=cparams,
        )(tokens, pos)


# ----------------------------------------------------------------------------
# Demo / check
# ----------------------------------------------------------------------------
if __name__ == "__main__":
    SEQ, BATCH, EMB = 8, 2, 32
    MAXLEN = 64
    DROPOUT = 0.1

    key = jax.random.PRNGKey(0)
    tokens = jax.random.normal(key, (SEQ, BATCH, EMB), dtype=jnp.float32)
    pos_embedding = make_pos_embedding(EMB, MAXLEN)

    # Eval-mode path (deterministic) -- check against pure-JAX reference.
    out_eval = positional_encoding_forward(tokens, pos_embedding,
                                           dropout_p=DROPOUT, training=False)
    out_eval = jax.block_until_ready(out_eval)
    ref_eval = tokens + pos_embedding[:SEQ]
    assert out_eval.shape == (SEQ, BATCH, EMB)
    assert jnp.allclose(out_eval, ref_eval, atol=1e-6, rtol=1e-6)

    # Training-mode path (dropout mask generated in-kernel with fixed seed).
    out_train = positional_encoding_forward(tokens, pos_embedding,
                                            dropout_p=DROPOUT, training=True,
                                            seed=1234)
    out_train = jax.block_until_ready(out_train)
    assert out_train.shape == (SEQ, BATCH, EMB)
    # Surviving elements == eval output scaled by 1/(1-p); dropped elements == 0.
    scaled_ref = ref_eval / (1.0 - DROPOUT)
    match_scaled = jnp.isclose(out_train, scaled_ref, atol=1e-5)
    is_zero = jnp.isclose(out_train, 0.0, atol=1e-7)
    assert bool(jnp.all(match_scaled | is_zero))

    print("KERNEL_OK")
</pallas_src>

<mosaic_0001>
module attributes {stable_mosaic.version = 11 : i64} {
  func.func @_pe_add_kernel(%arg0: i32, %arg1: memref<8x2x32xf32, #tpu.memory_space<vmem>>, %arg2: memref<8x1x32xf32, #tpu.memory_space<vmem>>, %arg3: memref<8x2x32xf32, #tpu.memory_space<vmem>>) attributes {dimension_semantics = [#tpu.dimension_semantics<parallel>], iteration_bounds = array<i64: 1>, scalar_prefetch = 0 : i64, scratch_operands = 0 : i64, tpu.core_type = #tpu.core_type<tc>, window_params = [{transform_indices = @transform_0, window_bounds = array<i64: 8, 2, 32>}, {transform_indices = @transform_1, window_bounds = array<i64: 8, 1, 32>}, {transform_indices = @transform_2, window_bounds = array<i64: 8, 2, 32>}]} {
    %c0 = arith.constant 0 : index
    %c0_0 = arith.constant 0 : index
    %c0_1 = arith.constant 0 : index
    %0 = vector.load %arg1[%c0, %c0_0, %c0_1] : memref<8x2x32xf32, #tpu.memory_space<vmem>>, vector<8x2x32xf32>
    %c0_2 = arith.constant 0 : index
    %c0_3 = arith.constant 0 : index
    %c0_4 = arith.constant 0 : index
    %1 = vector.load %arg2[%c0_2, %c0_3, %c0_4] : memref<8x1x32xf32, #tpu.memory_space<vmem>>, vector<8x1x32xf32>
    %2 = vector.broadcast %1 : vector<8x1x32xf32> to vector<8x2x32xf32>
    %3 = arith.addf %0, %2 : vector<8x2x32xf32>
    %c0_5 = arith.constant 0 : index
    %c0_6 = arith.constant 0 : index
    %c0_7 = arith.constant 0 : index
    %4 = vector.load %arg3[%c0_5, %c0_6, %c0_7] : memref<8x2x32xf32, #tpu.memory_space<vmem>>, vector<8x2x32xf32>
    tpu.vector_store %arg3[%c0_5, %c0_6, %c0_7], %3 {strides = array<i32>} : memref<8x2x32xf32, #tpu.memory_space<vmem>>, vector<8x2x32xf32>,
    return
  }
  func.func @transform_0(%arg0: i32) -> (i32, i32, i32) {
    %c0_i32 = arith.constant 0 : i32
    %c0_i32_0 = arith.constant 0 : i32
    %c0_i32_1 = arith.constant 0 : i32
    return %arg0, %c0_i32, %c0_i32_0 : i32, i32, i32
  }
  func.func @transform_1(%arg0: i32) -> (i32, i32, i32) {
    %c0_i32 = arith.constant 0 : i32
    %c0_i32_0 = arith.constant 0 : i32
    %c0_i32_1 = arith.constant 0 : i32
    return %arg0, %c0_i32, %c0_i32_0 : i32, i32, i32
  }
  func.func @transform_2(%arg0: i32) -> (i32, i32, i32) {
    %c0_i32 = arith.constant 0 : i32
    %c0_i32_0 = arith.constant 0 : i32
    %c0_i32_1 = arith.constant 0 : i32
    return %arg0, %c0_i32, %c0_i32_0 : i32, i32, i32
  }
}

</mosaic_0001>

<bundles_post_ra>
// kernel: tpu_custom_call.1
= control target key start
LH: loop header
LB: loop body
LE: loop exit
PB: predicated region body
PF: predicated region fallthrough
CT: control target
= control target key end

     0   :  { %vm84_vm0 = vcmask 254976   ;;  %s230_s0 = inlined_call_operand.vmem [shape: f32[8,2,32], index: 0, kind: input, shape index: {}]   ;;  %s231_s1 = inlined_call_operand.vmem [shape: f32[64,1,32], index: 1, kind: input, shape index: {}]   ;;  %s232_s2 = inlined_call_operand.hbm [shape: f32[8,2,32], index: 2, kind: output, shape index: {}]  }
   0x1   :  { %v12_v0 = vld [vmem:[%s230_s0] sm:$0x3]  ;;  %v13_v3 = vld [vmem:[%s230_s0 + $0x2] sm:$0x3]  ;;  %v14_v5 = vld [vmem:[%s230_s0 + $0x4] sm:$0x3] }
   0x2   :  { %v109_v1 = vld [vmem:[%s231_s1] ss:$0 sm:$0xff]  ;;  %v110_v4 = vld [vmem:[%s231_s1 + $0x1] ss:$0 sm:$0xff]  ;;  %v111_v7 = vld [vmem:[%s231_s1 + $0x2] ss:$0 sm:$0xff] }
   0x3   :  { %v76_v2 = vadd.f32 %v109_v1, %v12_v0  ;;  %v77_v6 = vadd.f32 %v110_v4, %v13_v3  ;;  %v15_v8 = vld [vmem:[%s230_s0 + $0x6] sm:$0x3]  ;;  %v112_v9 = vld [vmem:[%s231_s1 + $0x3] ss:$0 sm:$0xff]  ;;  %v78_v10 = vadd.f32 %v111_v7, %v14_v5  ;;  %v16_v12 = vld [vmem:[%s230_s0 + $0x8] sm:$0x3] }
   0x4   :  { %v79_v11 = vadd.f32 %v112_v9, %v15_v8  ;;  %v113_v13 = vld [vmem:[%s231_s1 + $0x4] ss:$0 sm:$0xff]  ;;  %v17_v14 = vld [vmem:[%s230_s0 + $0xa] sm:$0x3]  ;;  %v114_v16 = vld [vmem:[%s231_s1 + $0x5] ss:$0 sm:$0xff] }
   0x5   :  { %85 = vst.msk [vmem:[#allocation2] sm:$0x3] %vm84_vm0, %v76_v2  ;;  %86 = vst.msk [vmem:[#allocation2 + $0x2] sm:$0x3] %vm84_vm0, %v77_v6  ;;  %v80_v15 = vadd.f32 %v113_v13, %v16_v12  ;;  %v18_v17 = vld [vmem:[%s230_s0 + $0xc] sm:$0x3]  ;;  %v81_v19 = vadd.f32 %v114_v16, %v17_v14 }
   0x6   :  { %v115_v18 = vld [vmem:[%s231_s1 + $0x6] ss:$0 sm:$0xff]  ;;  %87 = vst.msk [vmem:[#allocation2 + $0x4] sm:$0x3] %vm84_vm0, %v78_v10  ;;  %88 = vst.msk [vmem:[#allocation2 + $0x6] sm:$0x3] %vm84_vm0, %v79_v11 }
   0x7   :  { %v82_v20 = vadd.f32 %v115_v18, %v18_v17  ;;  %v19_v21 = vld [vmem:[%s230_s0 + $0xe] sm:$0x3]  ;;  %v116_v22 = vld [vmem:[%s231_s1 + $0x7] ss:$0 sm:$0xff] }
   0x8   :  { %7 = vsyncpa [#allocation3], 0  ;;  %89 = vst.msk [vmem:[#allocation2 + $0x8] sm:$0x3] %vm84_vm0, %v80_v15  ;;  %v83_v23 = vadd.f32 %v116_v22, %v19_v21  ;;  %s144_s13 = smov [#allocation2]  }
   0x9   :  { %s98_s14 = sshll.u32 %s144_s13, 4  ;;  %90 = vst.msk [vmem:[#allocation2 + $0xa] sm:$0x3] %vm84_vm0, %v81_v19  ;;  %91 = vst.msk [vmem:[#allocation2 + $0xc] sm:$0x3] %vm84_vm0, %v82_v20  ;;  %s99_s14 = int_to_ptr.vmem [resolvable:$true] %s98_s14 }
   0xa   :  { %92 = vst.msk [vmem:[#allocation2 + $0xe] sm:$0x3] %vm84_vm0, %v83_v23  ;;  %s120_s15 = scalar_lea.vmem %s99_s14, 256  ;;  %p125_p1 = scmp.lt.s32.totalorder %s99_s14, %s99_s14 }
   0xb   :  { %p121_p0 = scmp.ne.s32.totalorder %s99_s14, %s120_s15  ;;  %p126_p2 = scmp.lt.s32.totalorder %s120_s15, %s120_s15 }
   0xd   :  { %p127_p3 = por %p126_p2, %p125_p1 }
   0xf   :  { %p128_p4 = pnand %p127_p3, %p121_p0 }
  0x11   :  { %131 = shalt.err (!%p128_p4)
}
  0x12   :  { %s132_s16 = scalar_lea.hbm %s232_s2, 256 }
  0x13   :  { %p133_p5 = scmp.ne.s32.totalorder %s232_s2, %s132_s16  ;;  %p136_p6 = scmp.lt.u32.totalorder %s132_s16, %s232_s2 }
  0x15   :  { %p138_p7 = pnand %p136_p6, %p133_p5 }
  0x17   :  { %141 = shalt.err (!%p138_p7)
}
  0x18   :  { %s145_s21 = smov 32   ;;  %s146_s22 = smov 2  }
  0x19   :  { %104 = dma.vmem_to_hbm [thread:$0]  %s99_s14, 256, %s232_s2, [#allocation3], %s145_s21, %s145_s21, %s146_s22  }
  0x1a   :  { %142 = dma.done.wait [#allocation3], 256  }
  0x1b   :  { %143 = vsyncadd [#allocation3], 4294967040 }
  0x1c   :  { %108 = vsyncpa [#allocation3], 1 }

</bundles_post_ra>
